<compile_context>
chip_gen: v7x
topology: tpu7x:2x2x1
jax: 0.10.0
libtpu: 0.0.40
codegen_flags: <defaults>
</compile_context>

<pallas_src>
import functools

import jax
import jax.numpy as jnp
from jax.experimental import pallas as pl
from jax.experimental.pallas import tpu as pltpu

EPS = 1e-12


# ----------------------------------------------------------------------------
# Single fused kernel: branch heads + CAUSALMER causal fusion (fusion_mode='sum')
# ----------------------------------------------------------------------------
def _make_fused_kernel(hidden, out_dim, pack_width):
    pack_raw = hidden + 11 * out_dim
    pad = pack_width - pack_raw

    def kernel(consts_ref, xl_ref, xa_ref, xv_ref,
               w_all_ref, b_all_ref, w2_ref, out_ref):
        dot = functools.partial(jnp.dot, preferred_element_type=jnp.float32)

        # ---- branch heads ----------------------------------------------
        # 1/T mean-pool scale is pre-folded into w_all -> plain temporal sum.
        pool_l = jnp.sum(xl_ref[...], axis=1)                     # (B, d_l)
        pool_a = jnp.sum(xa_ref[...], axis=1)                     # (B, d_a)
        pool_v = jnp.sum(xv_ref[...], axis=1)                     # (B, d_v)
        pooled = jnp.concatenate([pool_l, pool_a, pool_v], axis=-1)  # (B, d_tot)

        # One MXU pass produces the MULT hidden pre-activation and all three
        # unimodal heads (block-diagonal layout in w_all).
        fused = dot(pooled, w_all_ref[...])                       # (B, hidden+3*out)
        b_all = b_all_ref[...]                                    # (1, hidden+4*out)

        o0 = hidden
        o1 = hidden + out_dim
        o2 = hidden + 2 * out_dim
        o3 = hidden + 3 * out_dim
        o4 = hidden + 4 * out_dim

        h = jnp.maximum(fused[:, :hidden] + b_all[:, :hidden], 0.0)   # ReLU hidden
        t = fused[:, o0:o1] + b_all[:, o0:o1]                         # t_pred
        a = fused[:, o1:o2] + b_all[:, o1:o2]                         # a_pred
        v = fused[:, o2:o3] + b_all[:, o2:o3]                         # v_pred
        m = dot(h, w2_ref[...]) + b_all[:, o3:o4]                     # MULT logits

        # ---- CAUSALMER fusion (fusion_mode == 'sum', modality == 'tav') --
        c_t = consts_ref[0]
        c_a = consts_ref[1]
        c_v = consts_ref[2]
        c_ref = c_t + c_a + c_v

        def log_sig(z):
            # reference: log(sigmoid(z) + eps)
            return jnp.log(jax.nn.sigmoid(z) + EPS)

        s_tav = t + a + v
        z_tavm = log_sig(m + s_tav)                       # all facts True
        z_t = log_sig(t + 3.0 * c_t)                      # only t factual @ c_t
        z_a = log_sig(a + 3.0 * c_a)                      # only a factual @ c_a
        z_v = log_sig(v + 3.0 * c_v)                      # only v factual @ c_v
        # no facts @ c_ref: transform() replaces all four inputs by c_ref
        z_star = log_sig(jnp.zeros_like(m) + 4.0 * c_ref)

        nde_t = z_t - z_star
        nde_a = z_a - z_star
        nde_v = z_v - z_star
        te = z_tavm - z_star
        nde = nde_t + nde_a + nde_v
        cmer = z_tavm - z_t - z_a - z_v + 2.0 * z_star

        # ---- pack everything into one lane-dense output slab ------------
        pieces = [h, m, t, a, v, te, nde, nde_t, nde_a, nde_v, z_tavm, cmer]
        sizes = [hidden] + [out_dim] * 11
        off = 0
        for piece, size in zip(pieces, sizes):
            out_ref[:, off:off + size] = piece
            off += size
        if pad:
            out_ref[:, pack_raw:] = jnp.zeros((m.shape[0], pad), jnp.float32)

    return kernel


# ----------------------------------------------------------------------------
# Wrapper
# ----------------------------------------------------------------------------
_OUT_NAMES = ("mult_last_hs", "logits_m", "logits_t", "logits_a", "logits_v",
              "z_te", "z_nde", "z_nde_t", "z_nde_a", "z_nde_v",
              "logits_te", "logits_causal_mer")


@jax.jit
def causal_mer_forward(x_l, x_a, x_v, packed):
    w_all = packed["w_all"]
    b_all = packed["b_all"]
    w2 = packed["w2"]
    consts = packed["constants"]

    b = x_l.shape[0]
    hidden, out_dim = w2.shape
    pack_raw = hidden + 11 * out_dim
    pack_width = ((pack_raw + 127) // 128) * 128      # lane-dense output slab

    kernel = _make_fused_kernel(hidden, out_dim, pack_width)
    vmem = pl.BlockSpec(memory_space=pltpu.MemorySpace.VMEM)
    smem = pl.BlockSpec(memory_space=pltpu.MemorySpace.SMEM)

    slab = pl.pallas_call(
        kernel,
        out_shape=jax.ShapeDtypeStruct((b, pack_width), jnp.float32),
        in_specs=[smem, vmem, vmem, vmem, vmem, vmem, vmem],
        out_specs=vmem,
    )(consts, x_l, x_a, x_v, w_all, b_all, w2)

    # split the packed slab into the CAUSALMER output dict
    sizes = [hidden] + [out_dim] * 11
    out = {}
    off = 0
    for name, size in zip(_OUT_NAMES, sizes):
        out[name] = slab[:, off:off + size]
        off += size
    return out


# ----------------------------------------------------------------------------
# Deterministic parameter construction + packing
# ----------------------------------------------------------------------------
def make_params(key, d_l, d_a, d_v, t_l, t_a, t_v, hidden, out_dim, constant):
    ks = jax.random.split(key, 7)
    s = 0.05
    w_t = s * jax.random.normal(ks[0], (d_l, out_dim), jnp.float32)
    w_a = s * jax.random.normal(ks[1], (d_a, out_dim), jnp.float32)
    w_v = s * jax.random.normal(ks[2], (d_v, out_dim), jnp.float32)
    w1_t = s * jax.random.normal(ks[3], (d_l, hidden), jnp.float32)
    w1_a = s * jax.random.normal(ks[4], (d_a, hidden), jnp.float32)
    w1_v = s * jax.random.normal(ks[5], (d_v, hidden), jnp.float32)
    w2 = s * jax.random.normal(ks[6], (hidden, out_dim), jnp.float32)
    b1 = jnp.zeros((1, hidden), jnp.float32)
    b_t = jnp.zeros((1, out_dim), jnp.float32)
    b_a = jnp.zeros((1, out_dim), jnp.float32)
    b_v = jnp.zeros((1, out_dim), jnp.float32)
    b2 = jnp.zeros((1, out_dim), jnp.float32)

    d_tot = d_l + d_a + d_v
    # packed weight: columns [hidden | t-head | a-head | v-head], rows per
    # modality, with the 1/T mean-pool scale folded in.
    w_all = jnp.zeros((d_tot, hidden + 3 * out_dim), jnp.float32)
    w_all = w_all.at[0:d_l, 0:hidden].set(w1_t / t_l)
    w_all = w_all.at[d_l:d_l + d_a, 0:hidden].set(w1_a / t_a)
    w_all = w_all.at[d_l + d_a:, 0:hidden].set(w1_v / t_v)
    w_all = w_all.at[0:d_l, hidden:hidden + out_dim].set(w_t / t_l)
    w_all = w_all.at[d_l:d_l + d_a,
                     hidden + out_dim:hidden + 2 * out_dim].set(w_a / t_a)
    w_all = w_all.at[d_l + d_a:,
                     hidden + 2 * out_dim:hidden + 3 * out_dim].set(w_v / t_v)

    # packed bias row: [b1 | b_t | b_a | b_v | b2]
    b_all = jnp.concatenate([b1, b_t, b_a, b_v, b2], axis=-1)

    return {
        "w_all": w_all,
        "b_all": b_all,
        "w2": w2,
        # constant_t, constant_a, constant_v  (hyp_params.constant)
        "constants": jnp.array([constant, constant, constant], jnp.float32),
    }


if __name__ == "__main__":
    B, T_L, T_A, T_V = 2, 8, 8, 8
    D_L, D_A, D_V = 32, 16, 16
    HIDDEN, OUT_DIM = 32, 8
    CONSTANT = 0.5

    key = jax.random.PRNGKey(0)
    k_xl, k_xa, k_xv, k_p = jax.random.split(key, 4)
    x_l = jax.random.normal(k_xl, (B, T_L, D_L), jnp.float32)
    x_a = jax.random.normal(k_xa, (B, T_A, D_A), jnp.float32)
    x_v = jax.random.normal(k_xv, (B, T_V, D_V), jnp.float32)
    params = make_params(k_p, D_L, D_A, D_V, T_L, T_A, T_V,
                         HIDDEN, OUT_DIM, CONSTANT)

    out = causal_mer_forward(x_l, x_a, x_v, params)
    jax.block_until_ready(out)

    # light sanity checks
    assert out["logits_causal_mer"].shape == (B, OUT_DIM)
    assert out["logits_m"].shape == (B, OUT_DIM)
    assert out["mult_last_hs"].shape == (B, HIDDEN)
    assert all(bool(jnp.all(jnp.isfinite(v))) for v in out.values())
    # z_nde must equal the sum of its parts; te = logits_te - z_star consistency
    assert bool(jnp.allclose(out["z_nde"],
                             out["z_nde_t"] + out["z_nde_a"] + out["z_nde_v"],
                             atol=1e-5))
    print("KERNEL_OK")
</pallas_src>

<mosaic_0001>
module attributes {stable_mosaic.version = 11 : i64} {
  func.func @kernel(%arg0: memref<3xf32, #tpu.memory_space<smem>>, %arg1: memref<2x8x32xf32, #tpu.memory_space<vmem>>, %arg2: memref<2x8x16xf32, #tpu.memory_space<vmem>>, %arg3: memref<2x8x16xf32, #tpu.memory_space<vmem>>, %arg4: memref<64x56xf32, #tpu.memory_space<vmem>>, %arg5: memref<1x64xf32, #tpu.memory_space<vmem>>, %arg6: memref<32x8xf32, #tpu.memory_space<vmem>>, %arg7: memref<2x128xf32, #tpu.memory_space<vmem>>) attributes {dimension_semantics = [], scalar_prefetch = 0 : i64, scratch_operands = 0 : i64, tpu.core_type = #tpu.core_type<tc>} {
    %c0 = arith.constant 0 : index
    %c0_0 = arith.constant 0 : index
    %c0_1 = arith.constant 0 : index
    %0 = vector.load %arg1[%c0, %c0_0, %c0_1] : memref<2x8x32xf32, #tpu.memory_space<vmem>>, vector<2x8x32xf32>
    %cst = arith.constant dense<0.000000e+00> : vector<2x32xf32>
    %1 = vector.multi_reduction <add>, %0, %cst [1] : vector<2x8x32xf32> to vector<2x32xf32>
    %c0_2 = arith.constant 0 : index
    %c0_3 = arith.constant 0 : index
    %c0_4 = arith.constant 0 : index
    %2 = vector.load %arg2[%c0_2, %c0_3, %c0_4] : memref<2x8x16xf32, #tpu.memory_space<vmem>>, vector<2x8x16xf32>
    %cst_5 = arith.constant dense<0.000000e+00> : vector<2x16xf32>
    %3 = vector.multi_reduction <add>, %2, %cst_5 [1] : vector<2x8x16xf32> to vector<2x16xf32>
    %c0_6 = arith.constant 0 : index
    %c0_7 = arith.constant 0 : index
    %c0_8 = arith.constant 0 : index
    %4 = vector.load %arg3[%c0_6, %c0_7, %c0_8] : memref<2x8x16xf32, #tpu.memory_space<vmem>>, vector<2x8x16xf32>
    %cst_9 = arith.constant dense<0.000000e+00> : vector<2x16xf32>
    %5 = vector.multi_reduction <add>, %4, %cst_9 [1] : vector<2x8x16xf32> to vector<2x16xf32>
    %6 = tpu.concatenate %1, %3, %5 in 1 : vector<2x32xf32>, vector<2x16xf32>, vector<2x16xf32> -> vector<2x64xf32>
    %c0_10 = arith.constant 0 : index
    %c0_11 = arith.constant 0 : index
    %7 = vector.load %arg4[%c0_10, %c0_11] : memref<64x56xf32, #tpu.memory_space<vmem>>, vector<64x56xf32>
    %cst_12 = arith.constant dense<0.000000e+00> : vector<2x56xf32>
    %8 = tpu.matmul %6, %7, %cst_12 {dimension_numbers = #tpu.dot_dimension_numbers<[1], [0], [0], [1], [0, 0, 1, 1], [], []>} : vector<2x64xf32>, vector<64x56xf32>, vector<2x56xf32> -> vector<2x56xf32>
    %c0_13 = arith.constant 0 : index
    %c0_14 = arith.constant 0 : index
    %9 = vector.load %arg5[%c0_13, %c0_14] : memref<1x64xf32, #tpu.memory_space<vmem>>, vector<1x64xf32>
    %10 = vector.extract_strided_slice %8 {offsets = [0, 0], sizes = [2, 32], strides = [1, 1]} : vector<2x56xf32> to vector<2x32xf32>
    %11 = vector.extract_strided_slice %9 {offsets = [0, 0], sizes = [1, 32], strides = [1, 1]} : vector<1x64xf32> to vector<1x32xf32>
    %12 = vector.broadcast %11 : vector<1x32xf32> to vector<2x32xf32>
    %13 = arith.addf %10, %12 : vector<2x32xf32>
    %cst_15 = arith.constant 0.000000e+00 : f32
    %14 = vector.broadcast %cst_15 : f32 to vector<2x32xf32>
    %15 = arith.maximumf %13, %14 : vector<2x32xf32>
    %16 = vector.extract_strided_slice %8 {offsets = [0, 32], sizes = [2, 8], strides = [1, 1]} : vector<2x56xf32> to vector<2x8xf32>
    %17 = vector.extract_strided_slice %9 {offsets = [0, 32], sizes = [1, 8], strides = [1, 1]} : vector<1x64xf32> to vector<1x8xf32>
    %18 = vector.broadcast %17 : vector<1x8xf32> to vector<2x8xf32>
    %19 = arith.addf %16, %18 : vector<2x8xf32>
    %20 = vector.extract_strided_slice %8 {offsets = [0, 40], sizes = [2, 8], strides = [1, 1]} : vector<2x56xf32> to vector<2x8xf32>
    %21 = vector.extract_strided_slice %9 {offsets = [0, 40], sizes = [1, 8], strides = [1, 1]} : vector<1x64xf32> to vector<1x8xf32>
    %22 = vector.broadcast %21 : vector<1x8xf32> to vector<2x8xf32>
    %23 = arith.addf %20, %22 : vector<2x8xf32>
    %24 = vector.extract_strided_slice %8 {offsets = [0, 48], sizes = [2, 8], strides = [1, 1]} : vector<2x56xf32> to vector<2x8xf32>
    %25 = vector.extract_strided_slice %9 {offsets = [0, 48], sizes = [1, 8], strides = [1, 1]} : vector<1x64xf32> to vector<1x8xf32>
    %26 = vector.broadcast %25 : vector<1x8xf32> to vector<2x8xf32>
    %27 = arith.addf %24, %26 : vector<2x8xf32>
    %c0_16 = arith.constant 0 : index
    %c0_17 = arith.constant 0 : index
    %28 = vector.load %arg6[%c0_16, %c0_17] : memref<32x8xf32, #tpu.memory_space<vmem>>, vector<32x8xf32>
    %cst_18 = arith.constant dense<0.000000e+00> : vector<2x8xf32>
    %29 = tpu.matmul %15, %28, %cst_18 {dimension_numbers = #tpu.dot_dimension_numbers<[1], [0], [0], [1], [0, 0, 1, 1], [], []>} : vector<2x32xf32>, vector<32x8xf32>, vector<2x8xf32> -> vector<2x8xf32>
    %30 = vector.extract_strided_slice %9 {offsets = [0, 56], sizes = [1, 8], strides = [1, 1]} : vector<1x64xf32> to vector<1x8xf32>
    %31 = vector.broadcast %30 : vector<1x8xf32> to vector<2x8xf32>
    %32 = arith.addf %29, %31 : vector<2x8xf32>
    %c0_19 = arith.constant 0 : index
    %33 = memref.load %arg0[%c0_19] : memref<3xf32, #tpu.memory_space<smem>>
    %c1 = arith.constant 1 : index
    %34 = memref.load %arg0[%c1] : memref<3xf32, #tpu.memory_space<smem>>
    %c2 = arith.constant 2 : index
    %35 = memref.load %arg0[%c2] : memref<3xf32, #tpu.memory_space<smem>>
    %36 = arith.addf %33, %34 : f32
    %37 = arith.addf %36, %35 : f32
    %38 = arith.addf %19, %23 : vector<2x8xf32>
    %39 = arith.addf %38, %27 : vector<2x8xf32>
    %40 = arith.addf %32, %39 : vector<2x8xf32>
    %41 = arith.negf %40 : vector<2x8xf32>
    %42 = math.exp %41 : vector<2x8xf32>
    %cst_20 = arith.constant 1.000000e+00 : f32
    %43 = vector.broadcast %cst_20 : f32 to vector<2x8xf32>
    %44 = arith.addf %43, %42 : vector<2x8xf32>
    %45 = arith.divf %43, %44 : vector<2x8xf32>
    %cst_21 = arith.constant 9.99999996E-13 : f32
    %46 = vector.broadcast %cst_21 : f32 to vector<2x8xf32>
    %47 = arith.addf %45, %46 : vector<2x8xf32>
    %48 = math.log %47 : vector<2x8xf32>
    %cst_22 = arith.constant 3.000000e+00 : f32
    %49 = arith.mulf %cst_22, %33 : f32
    %50 = vector.broadcast %49 : f32 to vector<2x8xf32>
    %51 = arith.addf %19, %50 : vector<2x8xf32>
    %52 = arith.negf %51 : vector<2x8xf32>
    %53 = math.exp %52 : vector<2x8xf32>
    %cst_23 = arith.constant 1.000000e+00 : f32
    %54 = vector.broadcast %cst_23 : f32 to vector<2x8xf32>
    %55 = arith.addf %54, %53 : vector<2x8xf32>
    %56 = arith.divf %54, %55 : vector<2x8xf32>
    %cst_24 = arith.constant 9.99999996E-13 : f32
    %57 = vector.broadcast %cst_24 : f32 to vector<2x8xf32>
    %58 = arith.addf %56, %57 : vector<2x8xf32>
    %59 = math.log %58 : vector<2x8xf32>
    %cst_25 = arith.constant 3.000000e+00 : f32
    %60 = arith.mulf %cst_25, %34 : f32
    %61 = vector.broadcast %60 : f32 to vector<2x8xf32>
    %62 = arith.addf %23, %61 : vector<2x8xf32>
    %63 = arith.negf %62 : vector<2x8xf32>
    %64 = math.exp %63 : vector<2x8xf32>
    %cst_26 = arith.constant 1.000000e+00 : f32
    %65 = vector.broadcast %cst_26 : f32 to vector<2x8xf32>
    %66 = arith.addf %65, %64 : vector<2x8xf32>
    %67 = arith.divf %65, %66 : vector<2x8xf32>
    %cst_27 = arith.constant 9.99999996E-13 : f32
    %68 = vector.broadcast %cst_27 : f32 to vector<2x8xf32>
    %69 = arith.addf %67, %68 : vector<2x8xf32>
    %70 = math.log %69 : vector<2x8xf32>
    %cst_28 = arith.constant 3.000000e+00 : f32
    %71 = arith.mulf %cst_28, %35 : f32
    %72 = vector.broadcast %71 : f32 to vector<2x8xf32>
    %73 = arith.addf %27, %72 : vector<2x8xf32>
    %74 = arith.negf %73 : vector<2x8xf32>
    %75 = math.exp %74 : vector<2x8xf32>
    %cst_29 = arith.constant 1.000000e+00 : f32
    %76 = vector.broadcast %cst_29 : f32 to vector<2x8xf32>
    %77 = arith.addf %76, %75 : vector<2x8xf32>
    %78 = arith.divf %76, %77 : vector<2x8xf32>
    %cst_30 = arith.constant 9.99999996E-13 : f32
    %79 = vector.broadcast %cst_30 : f32 to vector<2x8xf32>
    %80 = arith.addf %78, %79 : vector<2x8xf32>
    %81 = math.log %80 : vector<2x8xf32>
    %cst_31 = arith.constant 0.000000e+00 : f32
    %82 = vector.broadcast %cst_31 : f32 to vector<2x8xf32>
    %cst_32 = arith.constant 4.000000e+00 : f32
    %83 = arith.mulf %cst_32, %37 : f32
    %84 = vector.broadcast %83 : f32 to vector<2x8xf32>
    %85 = arith.addf %82, %84 : vector<2x8xf32>
    %86 = arith.negf %85 : vector<2x8xf32>
    %87 = math.exp %86 : vector<2x8xf32>
    %cst_33 = arith.constant 1.000000e+00 : f32
    %88 = vector.broadcast %cst_33 : f32 to vector<2x8xf32>
    %89 = arith.addf %88, %87 : vector<2x8xf32>
    %90 = arith.divf %88, %89 : vector<2x8xf32>
    %cst_34 = arith.constant 9.99999996E-13 : f32
    %91 = vector.broadcast %cst_34 : f32 to vector<2x8xf32>
    %92 = arith.addf %90, %91 : vector<2x8xf32>
    %93 = math.log %92 : vector<2x8xf32>
    %94 = arith.subf %59, %93 : vector<2x8xf32>
    %95 = arith.subf %70, %93 : vector<2x8xf32>
    %96 = arith.subf %81, %93 : vector<2x8xf32>
    %97 = arith.subf %48, %93 : vector<2x8xf32>
    %98 = arith.addf %94, %95 : vector<2x8xf32>
    %99 = arith.addf %98, %96 : vector<2x8xf32>
    %100 = arith.subf %48, %59 : vector<2x8xf32>
    %101 = arith.subf %100, %70 : vector<2x8xf32>
    %102 = arith.subf %101, %81 : vector<2x8xf32>
    %cst_35 = arith.constant 2.000000e+00 : f32
    %103 = vector.broadcast %cst_35 : f32 to vector<2x8xf32>
    %104 = arith.mulf %103, %93 : vector<2x8xf32>
    %105 = arith.addf %102, %104 : vector<2x8xf32>
    %c0_36 = arith.constant 0 : index
    %c0_37 = arith.constant 0 : index
    %106 = vector.load %arg7[%c0_36, %c0_37] : memref<2x128xf32, #tpu.memory_space<vmem>>, vector<2x32xf32>
    tpu.vector_store %arg7[%c0_36, %c0_37], %15 {strides = array<i32>} : memref<2x128xf32, #tpu.memory_space<vmem>>, vector<2x32xf32>,
    %c0_38 = arith.constant 0 : index
    %c32 = arith.constant 32 : index
    %107 = vector.load %arg7[%c0_38, %c32] : memref<2x128xf32, #tpu.memory_space<vmem>>, vector<2x8xf32>
    tpu.vector_store %arg7[%c0_38, %c32], %32 {strides = array<i32>} : memref<2x128xf32, #tpu.memory_space<vmem>>, vector<2x8xf32>,
    %c0_39 = arith.constant 0 : index
    %c40 = arith.constant 40 : index
    %108 = vector.load %arg7[%c0_39, %c40] : memref<2x128xf32, #tpu.memory_space<vmem>>, vector<2x8xf32>
    tpu.vector_store %arg7[%c0_39, %c40], %19 {strides = array<i32>} : memref<2x128xf32, #tpu.memory_space<vmem>>, vector<2x8xf32>,
    %c0_40 = arith.constant 0 : index
    %c48 = arith.constant 48 : index
    %109 = vector.load %arg7[%c0_40, %c48] : memref<2x128xf32, #tpu.memory_space<vmem>>, vector<2x8xf32>
    tpu.vector_store %arg7[%c0_40, %c48], %23 {strides = array<i32>} : memref<2x128xf32, #tpu.memory_space<vmem>>, vector<2x8xf32>,
    %c0_41 = arith.constant 0 : index
    %c56 = arith.constant 56 : index
    %110 = vector.load %arg7[%c0_41, %c56] : memref<2x128xf32, #tpu.memory_space<vmem>>, vector<2x8xf32>
    tpu.vector_store %arg7[%c0_41, %c56], %27 {strides = array<i32>} : memref<2x128xf32, #tpu.memory_space<vmem>>, vector<2x8xf32>,
    %c0_42 = arith.constant 0 : index
    %c64 = arith.constant 64 : index
    %111 = vector.load %arg7[%c0_42, %c64] : memref<2x128xf32, #tpu.memory_space<vmem>>, vector<2x8xf32>
    tpu.vector_store %arg7[%c0_42, %c64], %97 {strides = array<i32>} : memref<2x128xf32, #tpu.memory_space<vmem>>, vector<2x8xf32>,
    %c0_43 = arith.constant 0 : index
    %c72 = arith.constant 72 : index
    %112 = vector.load %arg7[%c0_43, %c72] : memref<2x128xf32, #tpu.memory_space<vmem>>, vector<2x8xf32>
    tpu.vector_store %arg7[%c0_43, %c72], %99 {strides = array<i32>} : memref<2x128xf32, #tpu.memory_space<vmem>>, vector<2x8xf32>,
    %c0_44 = arith.constant 0 : index
    %c80 = arith.constant 80 : index
    %113 = vector.load %arg7[%c0_44, %c80] : memref<2x128xf32, #tpu.memory_space<vmem>>, vector<2x8xf32>
    tpu.vector_store %arg7[%c0_44, %c80], %94 {strides = array<i32>} : memref<2x128xf32, #tpu.memory_space<vmem>>, vector<2x8xf32>,
    %c0_45 = arith.constant 0 : index
    %c88 = arith.constant 88 : index
    %114 = vector.load %arg7[%c0_45, %c88] : memref<2x128xf32, #tpu.memory_space<vmem>>, vector<2x8xf32>
    tpu.vector_store %arg7[%c0_45, %c88], %95 {strides = array<i32>} : memref<2x128xf32, #tpu.memory_space<vmem>>, vector<2x8xf32>,
    %c0_46 = arith.constant 0 : index
    %c96 = arith.constant 96 : index
    %115 = vector.load %arg7[%c0_46, %c96] : memref<2x128xf32, #tpu.memory_space<vmem>>, vector<2x8xf32>
    tpu.vector_store %arg7[%c0_46, %c96], %96 {strides = array<i32>} : memref<2x128xf32, #tpu.memory_space<vmem>>, vector<2x8xf32>,
    %c0_47 = arith.constant 0 : index
    %c104 = arith.constant 104 : index
    %116 = vector.load %arg7[%c0_47, %c104] : memref<2x128xf32, #tpu.memory_space<vmem>>, vector<2x8xf32>
    tpu.vector_store %arg7[%c0_47, %c104], %48 {strides = array<i32>} : memref<2x128xf32, #tpu.memory_space<vmem>>, vector<2x8xf32>,
    %c0_48 = arith.constant 0 : index
    %c112 = arith.constant 112 : index
    %117 = vector.load %arg7[%c0_48, %c112] : memref<2x128xf32, #tpu.memory_space<vmem>>, vector<2x8xf32>
    tpu.vector_store %arg7[%c0_48, %c112], %105 {strides = array<i32>} : memref<2x128xf32, #tpu.memory_space<vmem>>, vector<2x8xf32>,
    %cst_49 = arith.constant 0.000000e+00 : f32
    %118 = vector.broadcast %cst_49 : f32 to vector<2x8xf32>
    %c0_50 = arith.constant 0 : index
    %c120 = arith.constant 120 : index
    %119 = vector.load %arg7[%c0_50, %c120] : memref<2x128xf32, #tpu.memory_space<vmem>>, vector<2x8xf32>
    tpu.vector_store %arg7[%c0_50, %c120], %118 {strides = array<i32>} : memref<2x128xf32, #tpu.memory_space<vmem>>, vector<2x8xf32>,
    return
  }
}

</mosaic_0001>

<bundles_post_ra>
// kernel: causal_mer_forward.1
= control target key start
LH: loop header
LB: loop body
LE: loop exit
PB: predicated region body
PF: predicated region fallthrough
CT: control target
= control target key end

     0   :  { %12 = vsyncpa [#allocation3], 0  ;;  %s774_s0 = inlined_call_operand.vmem [shape: f32[3], index: 0, kind: input, shape index: {}]   ;;  %s775_s1 = inlined_call_operand.vmem [shape: f32[2,8,32], index: 1, kind: input, shape index: {}]   ;;  %s776_s2 = inlined_call_operand.vmem [shape: f32[2,8,16], index: 2, kind: input, shape index: {}]   ;;  %s777_s3 = inlined_call_operand.vmem [shape: f32[2,8,16], index: 3, kind: input, shape index: {}]   ;;  %s778_s4 = inlined_call_operand.vmem [shape: f32[64,56], index: 4, kind: input, shape index: {}]   ;;  %s779_s5 = inlined_call_operand.vmem [shape: f32[1,64], index: 5, kind: input, shape index: {}]   ;;  %s780_s6 = inlined_call_operand.vmem [shape: f32[32,8], index: 6, kind: input, shape index: {}]   ;;  %s781_s7 = inlined_call_operand.vmem [shape: f32[2,128], index: 7, kind: output, shape index: {}]  }
   0x1   :  { %s19_s26 = sshll.u32 %s774_s0, 4  ;;  %s20_s26 = int_to_ptr.vmem [resolvable:$true] %s19_s26 }
   0x2   :  { %s569_s27 = scalar_lea.vmem %s20_s26, 16  ;;  %p574_p1 = scmp.lt.s32.totalorder %s20_s26, %s20_s26 }
   0x3   :  { %p570_p0 = scmp.ne.s32.totalorder %s20_s26, %s569_s27  ;;  %p575_p2 = scmp.lt.s32.totalorder %s569_s27, %s569_s27 }
   0x5   :  { %p576_p3 = por %p575_p2, %p574_p1 }
   0x7   :  { %p577_p4 = pnand %p576_p3, %p570_p0 }
   0x9   :  { %580 = shalt.err (!%p577_p4)
}
   0xa   :  { %s583_s28 = smov [#allocation2]  }
   0xb   :  { %22 = dma.vmem_to_smem %s20_s26, 16, %s583_s28, [#allocation3]  }
   0xc   :  { %581 = dma.done.wait [#allocation3], 16  }
   0xd   :  { %582 = vsyncadd [#allocation3], 4294967280 }
   0xe   :  { %38 = sfence }
   0xf   :  { %v56_v0 = vld [vmem:[%s776_s2] sm:$0xff]  ;;  %v57_v1 = vld [vmem:[%s776_s2 + $0x8] sm:$0xff]  ;;  %vm58_vm0 = vcmask 130048   ;;  %v584_v11 = vmov 0.0|0.0   ;;  %v111_v16 = vld [vmem:[%s778_s4 + $0x10] sm:$0xff]  ;;  %vm585_vm1 = vmmov 0  }
  0x10   :  { %v73_v2 = vld [vmem:[%s777_s3] sm:$0xff]  ;;  %v59_v3 = vsel %vm58_vm0, %v56_v0, 0.0  ;;  %v66_v4 = vsel %vm58_vm0, %v57_v1, 0.0  ;;  %v74_v5 = vld [vmem:[%s777_s3 + $0x8] sm:$0xff]  ;;  %505 = vmatprep.subr.bf16.mxu0 %v584_v11  ;;  %517 = vmatprep.subr.bf16.mxu1 %v584_v11  ;;  %v112_v17 = vld [vmem:[%s778_s4 + $0x18] sm:$0xff]  ;;  %v586_v41 = vmov 0.0  }
  0x11   :  { %v75_v6 = vsel %vm58_vm0, %v73_v2, 0.0  ;;  %v60_v7 = vrot.slane %v59_v3, 4  ;;  %v67_v8 = vrot.slane %v66_v4, 4  ;;  %v82_v10 = vsel %vm58_vm0, %v74_v5, 0.0  ;;  %v109_v12 = vld [vmem:[%s778_s4] sm:$0xff]  ;;  %v110_v13 = vld [vmem:[%s778_s4 + $0x8] sm:$0xff]  ;;  %491 = vmatprep.mubr.msk.f32.mxu0 %vm585_vm1, %v586_v41  ;;  %502 = vmatprep.mubr.msk.f32.mxu1 %vm585_vm1, %v586_v41 }
  0x12   :  { %v76_v9 = vrot.slane %v75_v6, 4  ;;  %v83_v14 = vrot.slane %v82_v10, 4  ;;  %v506_v15 = vpack.c.bf16 %v110_v13, %v109_v12  ;;  %v509_v22 = vpack.c.bf16 %v112_v17, %v111_v16  ;;  %v113_v26 = vld [vmem:[%s778_s4 + $0x20] sm:$0xff]  ;;  %v114_v27 = vld [vmem:[%s778_s4 + $0x28] sm:$0xff]  ;;  %v115_v39 = vld [vmem:[%s778_s4 + $0x30] sm:$0xff]  ;;  %s588_s8 = smov 48  }
  0x13   :  { %v61_v18 = vadd.f32 %v60_v7, %v59_v3  ;;  %v68_v19 = vadd.f32 %v67_v8, %v66_v4  ;;  %v200_v32 = vld [vmem:[%s780_s6] sm:$0xff]  ;;  %v201_v33 = vld [vmem:[%s780_s6 + $0x8] sm:$0xff]  ;;  %v512_v35 = vpack.c.bf16 %v114_v27, %v113_v26  ;;  %v116_v40 = vld [vmem:[%s778_s4 + $0x38] sm:$0xff]  ;;  %vm91_vm2 = vcmask 1041409   ;;  %s587_s4 = smov 32   ;;  %s589_s16 = smov 72  }
  0x14   :  { %v77_v20 = vadd.f32 %v76_v9, %v75_v6  ;;  %v84_v21 = vadd.f32 %v83_v14, %v82_v10  ;;  %507 = vmatpush3.bf16.msra.mxu0 %v506_v15  ;;  %v518_v43 = vpack.c.bf16 %v201_v33, %v200_v32  ;;  %v515_v48 = vpack.c.bf16 %v116_v40, %v115_v39  ;;  %v39_v51 = vld [vmem:[%s775_s1] sm:$0xff]  ;;  %v40_v52 = vld [vmem:[%s775_s1 + $0x8] sm:$0xff]  ;;  %v202_v8 = vld [vmem:[%s780_s6 + $0x10] sm:$0xff]  ;;  %s709_s3 = sld [smem:[#allocation2]]  ;;  %s454_s17 = sld [smem:[#allocation2 + $0x1]] }
  0x15   :  { %v62_v23 = vrot.slane %v61_v18, 2  ;;  %v69_v24 = vrot.slane %v68_v19, 2  ;;  %508 = vmatprep.subr.bf16.mxu0 %v584_v11  ;;  %vm41_vm3 = vcmask 261120   ;;  %vm107_vm4 = vcmask 392192   ;;  %v203_v9 = vld [vmem:[%s780_s6 + $0x18] sm:$0xff]  ;;  %s455_s18 = sld [smem:[#allocation2 + $0x2]] }
  0x16   :  { %v78_v25 = vrot.slane %v77_v20, 2  ;;  %v85_v28 = vrot.slane %v84_v21, 2  ;;  %519 = vmatpush3.bf16.msra.mxu1 %v518_v43  ;;  %v42_v53 = vsel %vm41_vm3, %v39_v51, 0.0  ;;  %v49_v54 = vsel %vm41_vm3, %v40_v52, 0.0  ;;  %s591_s25 = smov 112   ;;  %s592_s26 = smov 80  }
  0x17   :  { %v63_v29 = vadd.f32 %v62_v23, %v61_v18  ;;  %v70_v30 = vadd.f32 %v69_v24, %v68_v19  ;;  %520 = vmatprep.subr.bf16.mxu1 %v584_v11  ;;  %v43_v55 = vrot.slane %v42_v53, 4  ;;  %v50_v56 = vrot.slane %v49_v54, 4  ;;  %s593_s27 = smov 8   ;;  %s594_s29 = smov 96  }
  0x18   :  { %v79_v31 = vadd.f32 %v78_v25, %v77_v20  ;;  %v86_v34 = vadd.f32 %v85_v28, %v84_v21  ;;  %510 = vmatpush3.bf16.msra.mxu0 %v509_v22  ;;  %vm117_vm5 = vcmask 523264   ;;  %v521_v10 = vpack.c.bf16 %v203_v9, %v202_v8  ;;  %s595_s30 = smov 88   ;;  %s596_s9 = smov 40  }
  0x19   :  { %v64_v36 = vrot.slane %v63_v29, 1  ;;  %v71_v37 = vrot.slane %v70_v30, 1  ;;  %511 = vmatprep.subr.bf16.mxu0 %v584_v11  ;;  %v44_v57 = vadd.f32 %v43_v55, %v42_v53  ;;  %v51_v58 = vadd.f32 %v50_v56, %v49_v54  ;;  %s597_s0 = smov 104  }
  0x1a   :  { %v80_v38 = vrot.slane %v79_v31, 1  ;;  %v87_v42 = vrot.slane %v86_v34, 1  ;;  %522 = vmatpush3.bf16.msra.mxu1 %v521_v10  ;;  %s283_s19 = sadd.f32 %s454_s17, %s709_s3  ;;  %s320_s22 = smul.f32 3.0, %s454_s17  ;;  %vm387_vm6 = vcmask 254976   ;;  %vm393_vm7 = vcmask 320768  }
  0x1b   :  { %v65_v44 = vadd.f32 %v64_v36, %v63_v29  ;;  %v72_v45 = vadd.f32 %v71_v37, %v70_v30  ;;  %v45_v59 = vrot.slane %v44_v57, 2  ;;  %v52_v60 = vrot.slane %v51_v58, 2  ;;  %s332_s6 = smul.f32 3.0, %s455_s18 }
  0x1c   :  { %v81_v46 = vadd.f32 %v80_v38, %v79_v31  ;;  %v88_v47 = vadd.f32 %v87_v42, %v86_v34  ;;  %513 = vmatpush3.bf16.msra.mxu0 %v512_v35  ;;  %s284_s20 = sadd.f32 %s455_s18, %s283_s19  ;;  %v321_v15 = vstv %s320_s22  ;;  %s308_s28 = smul.f32 3.0, %s709_s3  ;;  %vm398_vm8 = vcmask 386368  }
  0x1d   :  { %v96_v49 = vsel %vm91_vm2, %v72_v45, %v65_v44  ;;  %514 = vmatprep.subr.bf16.mxu0 %v584_v11  ;;  %v46_v61 = vadd.f32 %v45_v59, %v44_v57  ;;  %v53_v62 = vadd.f32 %v52_v60, %v51_v58  ;;  %v452_v11 = vld [vmem:[%s779_s5] ss:$0 sm:$0xff]  ;;  %v333_v16 = vstv %s332_s6  ;;  %s590_s5 = smov 120  }
  0x1e   :  { %97 = vrot.lane.b32.xlu0 %v96_v49, %s587_s4  ;;  %v102_v50 = vsel %vm91_vm2, %v88_v47, %v81_v46  ;;  %s344_s21 = smul.f32 4.0, %s284_s20  ;;  %v309_v45 = vstv %s308_s28  ;;  %vm400_vm9 = vcmask 451968   ;;  %vm402_vm10 = vcmask 517568  }
  0x1f   :  { %v47_v63 = vrot.slane %v46_v61, 1  ;;  %v54_v0 = vrot.slane %v53_v62, 1  ;;  %vm408_vm11 = vcmask 583168   ;;  %vm414_vm12 = vcmask 648768  }
  0x20   :  { %516 = vmatpush3.bf16.msra.mxu0 %v515_v48  ;;  %v345_v12 = vstv %s344_s21  ;;  %vm420_vm13 = vcmask 714368   ;;  %vm425_vm14 = vcmask 779968   ;;  %vm430_vm15 = vcmask 845568  }
  0x21   :  { %v48_v1 = vadd.f32 %v47_v63, %v46_v61  ;;  %v55_v2 = vadd.f32 %v54_v0, %v53_v62  ;;  %v460_v13 = vmul.f32 -1.442695, %v345_v12  ;;  %vm436_vm0 = vcmask 911168  }
  0x22   :  { %103 = vrot.lane.b32.xlu0 %v102_v50, %s588_s8  ;;  %vm442_vm1 = vcmask 976768  }
  0x23   :  { %v92_v4 = vsel %vm91_vm2, %v55_v2, %v48_v1  ;;  %539 = vpow2.f32 %v460_v13  ;;  %vm444_vm2 = vcmask 1042368  }
  0x26   :  { %204 = vrot.lane.b32.xlu0 %v452_v11, %s589_s16 }
  0x2d   :  { %v540_v22 = vpop.eup %539 }
  0x2e   :  { %v350_v25 = vadd.f32 1.0, %v540_v22 }
  0x90   :  { %v98_v3 = vpop.permute.xlu0 %97 }
  0x91   :  { %v106_v5 = vsel %vm41_vm3, %v92_v4, %v98_v3 }
  0x94   :  { %v104_v6 = vpop.permute.xlu0 %103 }
  0x95   :  { %v108_v7 = vsel %vm107_vm4, %v106_v5, %v104_v6 }
  0x96   :  { %492 = vmatmul.mubr.msk.f32.vlgmr.msra.gmra.mrb[0].mxu0 %vm117_vm5, %v108_v7 }
  0x98   :  { %v205_v59 = vpop.permute.xlu0 %204 }
 0x169   :  { %v187_v14 = vpop.f32.mrb[0].mxu0 }
 0x16a   :  { %v198_v17 = vadd.f32 %v452_v11, %v187_v14  ;;  %v493_v18 = vpop.f32.mrb[1].mxu0 }
 0x16c   :  { %286 = vrot.lane.b32.xlu1 %v198_v17, %s590_s5  ;;  %v199_v19 = vmax.f32 %v198_v17, 0.0  ;;  %v322_v20 = vadd.f32 %v321_v15, %v198_v17  ;;  %v334_v21 = vadd.f32 %v333_v16, %v198_v17  ;;  %v310_v46 = vadd.f32 %v309_v45, %v198_v17 }
 0x16e   :  { %503 = vmatmul.mubr.msk.f32.vlgmr.msra.gmra.mrb[0].mxu1 %vm41_vm3, %v199_v19  ;;  %v458_v23 = vmul.f32 -1.442695, %v322_v20  ;;  %v459_v24 = vmul.f32 -1.442695, %v334_v21  ;;  %388 = vst.msk [vmem:[%s781_s7] sm:$0x3] %vm387_vm6, %v199_v19 }
 0x16f   :  { %v457_v47 = vmul.f32 -1.442695, %v310_v46 }
 0x170   :  { %290 = vrot.lane.b32.xlu1 %v198_v17, %s591_s25  ;;  %541 = vpow2.f32 %v458_v23 }
 0x171   :  { %543 = vpow2.f32 %v459_v24 }
 0x172   :  { %545 = vrcp.f32 %v350_v25 }
 0x17a   :  { %v542_v26 = vpop.eup %541 }
 0x17b   :  { %v544_v27 = vpop.eup %543  ;;  %v326_v28 = vadd.f32 1.0, %v542_v26 }
 0x17c   :  { %v338_v29 = vadd.f32 1.0, %v544_v27  ;;  %v546_v30 = vpop.eup %545 }
 0x17d   :  { %547 = vrcp.f32 %v326_v28  ;;  %v353_v31 = vadd.f32 1e-12, %v546_v30 }
 0x17e   :  { %549 = vrcp.f32 %v338_v29 }
 0x17f   :  { %551 = vlog2.f32 %v353_v31 }
 0x187   :  { %v548_v32 = vpop.eup %547 }
 0x188   :  { %v550_v33 = vpop.eup %549  ;;  %v329_v34 = vadd.f32 1e-12, %v548_v32 }
 0x189   :  { %v341_v35 = vadd.f32 1e-12, %v550_v33  ;;  %v552_v36 = vpop.eup %551 }
 0x18a   :  { %553 = vlog2.f32 %v329_v34  ;;  %v718_v37 = vmul.f32 0.6931472, %v552_v36 }
 0x18b   :  { %555 = vlog2.f32 %v341_v35 }
 0x18c   :  { %557 = vpow2.f32 %v457_v47  ;;  %v385_v19 = vmul.f32 2.0, %v718_v37 }
 0x194   :  { %v554_v38 = vpop.eup %553 }
 0x195   :  { %v556_v39 = vpop.eup %555  ;;  %v331_v40 = vmul.f32 0.6931472, %v554_v38 }
 0x196   :  { %v343_v43 = vmul.f32 0.6931472, %v556_v39  ;;  %v558_v48 = vpop.eup %557 }
 0x197   :  { %v357_v42 = vsub.f32 %v331_v40, %v718_v37  ;;  %v314_v49 = vadd.f32 1.0, %v558_v48 }
 0x198   :  { %v723_v44 = vsub.f32 %v343_v43, %v718_v37 }
 0x199   :  { %361 = vrot.lane.b32.xlu0 %v357_v42, %s590_s5  ;;  %559 = vrcp.f32 %v314_v49 }
 0x19d   :  { %366 = vrot.lane.b32.xlu0 %v723_v44, %s591_s25 }
 0x1a1   :  { %381 = vrot.lane.b32.xlu0 %v343_v43, %s592_s26 }
 0x1a3   :  { %v560_v50 = vpop.eup %559 }
 0x1a4   :  { %v317_v51 = vadd.f32 1e-12, %v560_v50 }
 0x1a5   :  { %395 = vrot.lane.b32.xlu0 %v198_v17, %s593_s27 }
 0x1a6   :  { %561 = vlog2.f32 %v317_v51 }
 0x1a9   :  { %422 = vrot.lane.b32.xlu0 %v357_v42, %s588_s8 }
 0x1b0   :  { %v562_v56 = vpop.eup %561 }
 0x1b1   :  { %v319_v57 = vmul.f32 0.6931472, %v562_v56 }
 0x1b3   :  { %v356_v58 = vsub.f32 %v319_v57, %v718_v37 }
 0x1de   :  { %v287_v52 = vpop.permute.xlu1 %286 }
 0x1df   :  { %v289_v53 = vadd.f32 %v287_v52, %v198_v17 }
 0x1e2   :  { %v291_v54 = vpop.permute.xlu1 %290 }
 0x1e3   :  { %v293_v55 = vadd.f32 %v291_v54, %v289_v53 }
 0x1e5   :  { %295 = vrot.lane.b32.xlu1 %v293_v55, %s594_s29 }
 0x1e9   :  { %371 = vrot.lane.b32.xlu1 %v319_v57, %s594_s29 }
 0x1ed   :  { %376 = vrot.lane.b32.xlu1 %v331_v40, %s595_s30 }
 0x1f1   :  { %417 = vrot.lane.b32.xlu1 %v356_v58, %s588_s8 }
 0x20b   :  { %v362_v60 = vpop.permute.xlu0 %361 }
 0x20c   :  { %v364_v61 = vadd.f32 %v362_v60, %v356_v58 }
 0x20f   :  { %v367_v62 = vpop.permute.xlu0 %366 }
 0x210   :  { %v369_v63 = vadd.f32 %v367_v62, %v364_v61 }
 0x212   :  { %411 = vrot.lane.b32.xlu0 %v369_v63, %s596_s9 }
 0x213   :  { %v382_v17 = vpop.permute.xlu0 %381 }
 0x217   :  { %v396_v23 = vpop.permute.xlu0 %395 }
 0x21b   :  { %v423_v24 = vpop.permute.xlu0 %422 }
 0x241   :  { %v276_v0 = vpop.f32.mrb[0].mxu1 }
 0x242   :  { %v277_v1 = vadd.f32 %v276_v0, %v205_v59  ;;  %v504_v2 = vpop.f32.mrb[1].mxu1 }
 0x244   :  { %390 = vrot.lane.b32.xlu1 %v277_v1, %s587_s4  ;;  %s598_s4 = smov 64  }
 0x257   :  { %v296_v3 = vpop.permute.xlu1 %295 }
 0x258   :  { %v298_v4 = vadd.f32 %v296_v3, %v277_v1 }
 0x25a   :  { %v456_v5 = vmul.f32 -1.442695, %v298_v4 }
 0x25b   :  { %v372_v10 = vpop.permute.xlu1 %371 }
 0x25c   :  { %563 = vpow2.f32 %v456_v5 }
 0x25f   :  { %v377_v15 = vpop.permute.xlu1 %376 }
 0x263   :  { %v418_v21 = vpop.permute.xlu1 %417 }
 0x266   :  { %v564_v6 = vpop.eup %563 }
 0x267   :  { %v302_v7 = vadd.f32 1.0, %v564_v6 }
 0x269   :  { %565 = vrcp.f32 %v302_v7 }
 0x273   :  { %v566_v8 = vpop.eup %565 }
 0x274   :  { %v305_v9 = vadd.f32 1e-12, %v566_v8 }
 0x276   :  { %567 = vlog2.f32 %v305_v9 }
 0x280   :  { %v568_v11 = vpop.eup %567 }
 0x281   :  { %v307_v12 = vmul.f32 0.6931472, %v568_v11 }
 0x283   :  { %v374_v13 = vsub.f32 %v307_v12, %v372_v10  ;;  %433 = vrot.lane.b32.xlu0 %v307_v12, %s597_s0  ;;  %v359_v14 = vsub.f32 %v307_v12, %v718_v37 }
 0x284   :  { %v412_v26 = vpop.permute.xlu0 %411 }
 0x285   :  { %v379_v16 = vsub.f32 %v374_v13, %v377_v15  ;;  %405 = vrot.lane.b32.xlu1 %v359_v14, %s598_s4 }
 0x287   :  { %v384_v18 = vsub.f32 %v379_v16, %v382_v17 }
 0x289   :  { %427 = vrot.lane.b32.xlu1 %v723_v44, %s588_s8  ;;  %v386_v20 = vadd.f32 %v385_v19, %v384_v18 }
 0x28d   :  { %439 = vrot.lane.b32.xlu1 %v386_v20, %s591_s25 }
 0x2b6   :  { %v391_v22 = vpop.permute.xlu1 %390 }
 0x2b7   :  { %394 = vst.msk [vmem:[%s781_s7] sm:$0x3] %vm393_vm7, %v391_v22 }
 0x2b8   :  { %399 = vst.msk [vmem:[%s781_s7] sm:$0x3] %vm398_vm8, %v396_v23 }
 0x2b9   :  { %401 = vst.msk [vmem:[%s781_s7] sm:$0x3] %vm400_vm9, %v396_v23 }
 0x2ba   :  { %403 = vst.msk [vmem:[%s781_s7] sm:$0x3] %vm402_vm10, %v396_v23 }
 0x2f5   :  { %v434_v28 = vpop.permute.xlu0 %433 }
 0x2f7   :  { %v406_v25 = vpop.permute.xlu1 %405 }
 0x2f8   :  { %409 = vst.msk [vmem:[%s781_s7] sm:$0x3] %vm408_vm11, %v406_v25 }
 0x2f9   :  { %415 = vst.msk [vmem:[%s781_s7] sm:$0x3] %vm414_vm12, %v412_v26 }
 0x2fa   :  { %421 = vst.msk [vmem:[%s781_s7] sm:$0x3] %vm420_vm13, %v418_v21 }
 0x2fb   :  { %426 = vst.msk [vmem:[%s781_s7] sm:$0x3] %vm425_vm14, %v423_v24  ;;  %v428_v27 = vpop.permute.xlu1 %427 }
 0x2fc   :  { %431 = vst.msk [vmem:[%s781_s7] sm:$0x3] %vm430_vm15, %v428_v27 }
 0x2fd   :  { %437 = vst.msk [vmem:[%s781_s7] sm:$0x3] %vm436_vm0, %v434_v28 }
 0x2ff   :  { %v440_v29 = vpop.permute.xlu1 %439 }
 0x300   :  { %443 = vst.msk [vmem:[%s781_s7] sm:$0x3] %vm442_vm1, %v440_v29 }
 0x301   :  { %445 = vst.msk [vmem:[%s781_s7] sm:$0x3] %vm444_vm2, %v586_v41 }
 0x302   :  { %450 = vsyncpa [#allocation3], 1 }

</bundles_post_ra>
